<compile_context>
chip_gen: v5e
topology: v5e:2x2
jax: 0.10.0
libtpu: 0.0.40
codegen_flags: <defaults>
</compile_context>

<pallas_src>
import jax
import jax.numpy as jnp
from jax.experimental import pallas as pl
from jax.experimental.pallas import tpu as pltpu

LABEL_SMOOTHING = 0.1


def _round_up(a, b):
    return (a + b - 1) // b * b


def _tpu_vmem_capacity_bytes():
    try:
        return int(pltpu.get_tpu_info().vmem_capacity_bytes)
    except Exception:
        return 64 * 1024 * 1024  # conservative fallback (v7x per-TC VMEM)


def lossA_pallas(x, labels):
    """Cross entropy with label_smoothing=0.1, mean reduction (PyTorch semantics)."""
    n, c = x.shape
    eps = float(LABEL_SMOOTHING)

    # ---- class-major views (lane-dense for small C) -----------------------
    x_t = x.T                                   # (C, N); batch -> lanes
    lbl_2d = labels.astype(jnp.int32).reshape(1, n)

    # ---- generation-aware tile sizing --------------------------------------
    vmem_cap = _tpu_vmem_capacity_bytes()
    if vmem_cap >= 100 * 1024 * 1024:           # v5e / v6e: 128 MiB VMEM per TC
        working_budget = 32 * 1024 * 1024       # ~16 MiB per x block (double-buffered)
        vmem_limit = 72 * 1024 * 1024
    else:                                       # v7x: 64 MiB VMEM per TC
        working_budget = 20 * 1024 * 1024       # ~10 MiB per x block
        vmem_limit = 32 * 1024 * 1024

    # VMEM bytes per column of the working set (sublane-padded, f32 upper bound):
    #   2x double-buffered x blocks + 2x label blocks + accumulator.
    x_col_bytes = _round_up(c, 8) * 4
    per_col_bytes = 2 * x_col_bytes + 2 * 8 * 4 + 2 * 8 * 4
    tile_cols = max(128, (working_budget // per_col_bytes) // 128 * 128)
    tile_cols = min(tile_cols, _round_up(n, 128))

    num_tiles = (n + tile_cols - 1) // tile_cols
    steps_per_core = (num_tiles + 1) // 2       # grid = (2, steps_per_core)

    def col_block(p, j):
        # Clamp so a fully out-of-range step (odd num_tiles) re-reads a valid
        # block; its contribution is masked to zero inside the kernel.
        return (0, jnp.minimum(p * steps_per_core + j, num_tiles - 1))

    def kernel(x_ref, lbl_ref, acc_ref):
        p = pl.program_id(0)
        j = pl.program_id(1)

        @pl.when(j == 0)
        def _init():
            acc_ref[...] = jnp.zeros_like(acc_ref)

        xt = x_ref[...].astype(jnp.float32)      # [C, T]
        lbl = lbl_ref[...]                       # [1, T] int32

        # numerically stable log-sum-exp over the class (sublane) axis
        m = jnp.max(xt, axis=0, keepdims=True)   # [1, T]
        shifted = xt - m                         # [C, T]
        lse = jnp.log(jnp.sum(jnp.exp(shifted), axis=0, keepdims=True))  # [1, T]

        # fused label-pick + smoothing term: w = eps/C + (1-eps)*[cls == y]
        cls = jax.lax.broadcasted_iota(jnp.int32, (c, tile_cols), 0)
        w = jnp.where(cls == lbl, 1.0 - eps + eps / c, eps / c)          # [C, T]
        dot = jnp.sum(shifted * w, axis=0, keepdims=True)                # [1, T]

        per = lse - dot                          # [1, T] per-sample smoothed CE

        # mask out-of-bounds columns (true batch size n is static)
        col0 = (p * steps_per_core + j) * tile_cols
        col = jax.lax.broadcasted_iota(jnp.int32, (1, tile_cols), 1) + col0
        per = jnp.where(col < n, per, 0.0)       # select, not multiply (NaN-safe)

        acc_ref[...] += per[None, :, :]          # lane-partial accumulation

    partials = pl.pallas_call(
        kernel,
        out_shape=jax.ShapeDtypeStruct((2, 1, tile_cols), jnp.float32),
        grid_spec=pl.GridSpec(
            grid=(2, steps_per_core),
            in_specs=[
                pl.BlockSpec((c, tile_cols), col_block),
                pl.BlockSpec((1, tile_cols), col_block),
            ],
            out_specs=pl.BlockSpec((1, 1, tile_cols), lambda p, j: (p, 0, 0)),
        ),
        compiler_params=pltpu.CompilerParams(
            dimension_semantics=("parallel", "arbitrary"),
            vmem_limit_bytes=vmem_limit,
        ),
    )(x_t, lbl_2d)

    # tiny final reduction over lane partials; mean over the TRUE batch size
    return jnp.sum(partials) / jnp.float32(n)


def lossA_ref(x, labels):
    # pure-JAX reference of PyTorch CrossEntropyLoss(label_smoothing=0.1)
    n, c = x.shape
    logp = jax.nn.log_softmax(x.astype(jnp.float32), axis=-1)
    one_hot = jax.nn.one_hot(labels, c, dtype=jnp.float32)
    q = (1.0 - LABEL_SMOOTHING) * one_hot + LABEL_SMOOTHING / c
    return jnp.mean(-jnp.sum(q * logp, axis=-1))


if __name__ == "__main__":
    key = jax.random.PRNGKey(0)
    kx, kl = jax.random.split(key)

    # talknet-ASD lossA scores per frame over 2 classes (speaking / not speaking)
    N, C = 16, 2
    x = jax.random.normal(kx, (N, C), dtype=jnp.float32)
    labels = jax.random.randint(kl, (N,), 0, C, dtype=jnp.int32)

    loss = lossA_pallas(x, labels)
    jax.block_until_ready(loss)
    ref = lossA_ref(x, labels)
    assert jnp.allclose(loss, ref, atol=1e-5, rtol=1e-5), (loss, ref)

    # tail-masking path: batch not a multiple of the lane tile, odd class count
    N2, C2 = 13, 5
    x2 = jax.random.normal(kx, (N2, C2), dtype=jnp.float32)
    l2 = jax.random.randint(kl, (N2,), 0, C2, dtype=jnp.int32)
    loss2 = lossA_pallas(x2, l2)
    jax.block_until_ready(loss2)
    assert jnp.allclose(loss2, lossA_ref(x2, l2), atol=1e-5, rtol=1e-5), (loss2,)

    print("KERNEL_OK")
</pallas_src>

<mosaic_0001>
module attributes {stable_mosaic.version = 11 : i64} {
  func.func @kernel(%arg0: i32, %arg1: i32, %arg2: memref<2x128xf32, #tpu.memory_space<vmem>>, %arg3: memref<1x128xi32, #tpu.memory_space<vmem>>, %arg4: memref<1x1x128xf32, #tpu.memory_space<vmem>>) attributes {dimension_semantics = [#tpu.dimension_semantics<parallel>, #tpu.dimension_semantics<arbitrary>], iteration_bounds = array<i64: 2, 1>, scalar_prefetch = 0 : i64, scratch_operands = 0 : i64, tpu.core_type = #tpu.core_type<tc>, window_params = [{transform_indices = @transform_0, window_bounds = array<i64: 2, 128>}, {transform_indices = @transform_1, window_bounds = array<i64: 1, 128>}, {transform_indices = @transform_2, window_bounds = array<i64: 1, 1, 128>}]} {
    %c0_i32 = arith.constant 0 : i32
    %0 = arith.cmpi eq, %arg1, %c0_i32 : i32
    %1 = arith.extui %0 : i1 to i32
    %c0_i32_0 = arith.constant 0 : i32
    %2 = arith.cmpi ne, %1, %c0_i32_0 : i32
    scf.if %2 {
      %cst_15 = arith.constant 0.000000e+00 : f32
      %37 = vector.broadcast %cst_15 : f32 to vector<1x1x128xf32>
      %c0_16 = arith.constant 0 : index
      %c0_17 = arith.constant 0 : index
      %c0_18 = arith.constant 0 : index
      %38 = vector.load %arg4[%c0_16, %c0_17, %c0_18] : memref<1x1x128xf32, #tpu.memory_space<vmem>>, vector<1x1x128xf32>
      tpu.vector_store %arg4[%c0_16, %c0_17, %c0_18], %37 {strides = array<i32>} : memref<1x1x128xf32, #tpu.memory_space<vmem>>, vector<1x1x128xf32>,
    } else {
    }
    %c0 = arith.constant 0 : index
    %c0_1 = arith.constant 0 : index
    %3 = vector.load %arg2[%c0, %c0_1] : memref<2x128xf32, #tpu.memory_space<vmem>>, vector<2x128xf32>
    %c0_2 = arith.constant 0 : index
    %c0_3 = arith.constant 0 : index
    %4 = vector.load %arg3[%c0_2, %c0_3] : memref<1x128xi32, #tpu.memory_space<vmem>>, vector<1x128xi32>
    %cst = arith.constant dense<0xFF800000> : vector<128xf32>
    %5 = vector.multi_reduction <maximumf>, %3, %cst [0] : vector<2x128xf32> to vector<128xf32>
    %6 = vector.shape_cast %5 : vector<128xf32> to vector<1x128xf32>
    %7 = vector.broadcast %6 : vector<1x128xf32> to vector<2x128xf32>
    %8 = arith.subf %3, %7 : vector<2x128xf32>
    %9 = math.exp %8 : vector<2x128xf32>
    %cst_4 = arith.constant dense<0.000000e+00> : vector<128xf32>
    %10 = vector.multi_reduction <add>, %9, %cst_4 [0] : vector<2x128xf32> to vector<128xf32>
    %11 = vector.shape_cast %10 : vector<128xf32> to vector<1x128xf32>
    %12 = math.log %11 : vector<1x128xf32>
    %13 = tpu.iota {dimensions = array<i32: 0>} : vector<2x128xi32>
    %14 = vector.broadcast %4 : vector<1x128xi32> to vector<2x128xi32>
    %15 = arith.cmpi eq, %13, %14 : vector<2x128xi32>
    %cst_5 = arith.constant 0.949999988 : f32
    %cst_6 = arith.constant 5.000000e-02 : f32
    %16 = vector.broadcast %cst_5 : f32 to vector<2x128xf32>
    %17 = vector.broadcast %cst_6 : f32 to vector<2x128xf32>
    %18 = arith.select %15, %16, %17 : vector<2x128xi1>, vector<2x128xf32>
    %19 = arith.mulf %8, %18 : vector<2x128xf32>
    %cst_7 = arith.constant dense<0.000000e+00> : vector<128xf32>
    %20 = vector.multi_reduction <add>, %19, %cst_7 [0] : vector<2x128xf32> to vector<128xf32>
    %21 = vector.shape_cast %20 : vector<128xf32> to vector<1x128xf32>
    %22 = arith.subf %12, %21 : vector<1x128xf32>
    %c1_i32 = arith.constant 1 : i32
    %23 = arith.muli %arg0, %c1_i32 : i32
    %24 = arith.addi %23, %arg1 : i32
    %c128_i32 = arith.constant 128 : i32
    %25 = arith.muli %24, %c128_i32 : i32
    %26 = tpu.iota {dimensions = array<i32: 1>} : vector<1x128xi32>
    %27 = vector.broadcast %25 : i32 to vector<1x128xi32>
    %28 = arith.addi %26, %27 : vector<1x128xi32>
    %c16_i32 = arith.constant 16 : i32
    %29 = vector.broadcast %c16_i32 : i32 to vector<1x128xi32>
    %30 = arith.cmpi slt, %28, %29 : vector<1x128xi32>
    %cst_8 = arith.constant 0.000000e+00 : f32
    %31 = vector.broadcast %cst_8 : f32 to vector<1x128xf32>
    %32 = arith.select %30, %22, %31 : vector<1x128xi1>, vector<1x128xf32>
    %c0_9 = arith.constant 0 : index
    %c0_10 = arith.constant 0 : index
    %c0_11 = arith.constant 0 : index
    %33 = vector.load %arg4[%c0_9, %c0_10, %c0_11] : memref<1x1x128xf32, #tpu.memory_space<vmem>>, vector<1x1x128xf32>
    %34 = vector.shape_cast %32 : vector<1x128xf32> to vector<1x1x128xf32>
    %35 = arith.addf %33, %34 : vector<1x1x128xf32>
    %c0_12 = arith.constant 0 : index
    %c0_13 = arith.constant 0 : index
    %c0_14 = arith.constant 0 : index
    %36 = vector.load %arg4[%c0_12, %c0_13, %c0_14] : memref<1x1x128xf32, #tpu.memory_space<vmem>>, vector<1x1x128xf32>
    tpu.vector_store %arg4[%c0_12, %c0_13, %c0_14], %35 {strides = array<i32>} : memref<1x1x128xf32, #tpu.memory_space<vmem>>, vector<1x1x128xf32>,
    return
  }
  func.func @transform_0(%arg0: i32, %arg1: i32) -> (i32, i32) {
    %c1_i32 = arith.constant 1 : i32
    %0 = arith.muli %arg0, %c1_i32 : i32
    %1 = arith.addi %0, %arg1 : i32
    %c0_i32 = arith.constant 0 : i32
    %2 = arith.minsi %1, %c0_i32 : i32
    %c0_i32_0 = arith.constant 0 : i32
    %c0_i32_1 = arith.constant 0 : i32
    return %c0_i32_0, %2 : i32, i32
  }
  func.func @transform_1(%arg0: i32, %arg1: i32) -> (i32, i32) {
    %c1_i32 = arith.constant 1 : i32
    %0 = arith.muli %arg0, %c1_i32 : i32
    %1 = arith.addi %0, %arg1 : i32
    %c0_i32 = arith.constant 0 : i32
    %2 = arith.minsi %1, %c0_i32 : i32
    %c0_i32_0 = arith.constant 0 : i32
    %c0_i32_1 = arith.constant 0 : i32
    return %c0_i32_0, %2 : i32, i32
  }
  func.func @transform_2(%arg0: i32, %arg1: i32) -> (i32, i32, i32) {
    %c0_i32 = arith.constant 0 : i32
    %c0_i32_0 = arith.constant 0 : i32
    %c0_i32_1 = arith.constant 0 : i32
    return %arg0, %c0_i32, %c0_i32_0 : i32, i32, i32
  }
}

</mosaic_0001>

<bundles_post_ra>
// kernel: tpu_custom_call.1
= control target key start
LH: loop header
LB: loop body
LE: loop exit
PB: predicated region body
PF: predicated region fallthrough
CT: control target
= control target key end

     0   :  { %7 = vsyncpa [#allocation3], 0  ;;  %s868_s0 = inlined_call_operand.hbm [shape: f32[2,16], index: 0, kind: input, shape index: {}]   ;;  %s869_s1 = inlined_call_operand.hbm [shape: s32[1,16], index: 1, kind: input, shape index: {}]   ;;  %s870_s2 = inlined_call_operand.hbm [shape: f32[2,1,128], index: 2, kind: output, shape index: {}]  }
   0x1   :  { %9 = vsyncpa [#allocation3 + $0x1], 0 }
   0x2   :  { %10 = vsyncpa [#allocation6], 0 }
   0x3   :  { %12 = vsyncpa [#allocation6 + $0x1], 0 }
   0x4   :  { %13 = vsyncpa [#allocation4], 0 }
   0x5   :  { %15 = vsyncpa [#allocation4 + $0x1], 0  ;;  %s686_s9 = smov 0   ;;  %s688_s10 = smov 0  }
   0x6   :  { %s690_s11 = smov 0   ;;  %s692_s12 = smov 0  }
   0x7   :  { %s694_s13 = smov 0   ;;  %s696_s14 = smov 0  }
   0x8   :  { %s698_s15 = smov 0   ;;  %s700_s16 = smov 0  }
   0x9 LB: > { %s389_s17 = sadd.s32 4294967295, %s665_s16   ;;  %s390_s18 = sadd.s32 4294967294, %s665_s16   ;;  %s665_s16 = sphi %s700_s16, %s21_s16   ;;  %s661_s15 = sphi %s698_s15, %s882_s15   ;;  %s657_s14 = sphi %s696_s14, %s881_s14   ;;  %s653_s13 = sphi %s694_s13, %s858_s13   ;;  %s649_s12 = sphi %s692_s12, %s880_s12   ;;  %s645_s11 = sphi %s690_s11, %s879_s11   ;;  %s641_s10 = sphi %s688_s10, %s878_s10   ;;  %s637_s9 = sphi %s686_s9, %s877_s9  }
   0xa   : > { %s33_s19 = sadd.s32 1, %s661_s15  ;;  %p634_p1 = scmp.ne.s32.totalorder %s653_s13, 0 }
   0xb   : > { %p35_p0 = scmp.ge.s32.totalorder %s33_s19, 2  ;;  %p54_p2 = scmp.eq.s32.totalorder %s665_s16, 0 }
   0xc   : > { %p59_p3 = scmp.ne.s32.totalorder %s653_s13, %s649_s12  ;;  %p60_p5 = scmp.eq.s32.totalorder %s389_s17, 0 }
   0xd   : > { %s884_s19 = smov (%p35_p0, %s33_s19), 0  ;;  %p732_p4 = por %p634_p1, %p54_p2 }
   0xe   : > { %p736_p6 = por %p60_p5, %p59_p3  ;;  %s101_s22 = ssub.s32 %s661_s15, %s884_s19 }
   0xf   : > { %p102_p7 = scmp.eq.s32.totalorder %s101_s22, 0  ;;  %s104_s23 = sadd.s32 1, %s645_s11 }
  0x10   : > { %p114_p8 = scmp.ne.s32.totalorder %s645_s11, %s641_s10  ;;  %p115_p9 = scmp.eq.s32.totalorder %s389_s17, 1 }
  0x11   : > { %s744_s24 = scalar_select %p102_p7, %s645_s11, %s104_s23  }
  0x12   : > { %p120_p10 = scmp.ne.s32.totalorder %s641_s10, %s637_s9  ;;  %p121_p11 = scmp.eq.s32.totalorder %s390_s18, 1 }
  0x13   : > { %p750_p12 = por %p115_p9, %p114_p8  ;;  %p392_p13 = scmp.ge.s32.totalorder %s665_s16, 2 }
  0x14   : > { %p755_p0 = por %p121_p11, %p120_p10  ;;  %p417_p1 = scmp.lt.s32.totalorder %s665_s16, 2 }
  0x15   : > { %s154_s29 = sshll.u32 %s868_s0, 4  ;;  %s667_s30 = smov [#allocation2]   ;;  %s155_s29 = int_to_ptr.hbm [resolvable:$true] %s154_s29 }
  0x16   : > { %s156_s3 = sshll.u32 %s667_s30, 4  ;;  %p765_p2 = pnand %p417_p1, %p732_p4  ;;  %s157_s3 = int_to_ptr.vmem [resolvable:$true] %s156_s3 }
  0x17   : > { %p395_p3 = scmp.ge.s32.totalorder %s665_s16, 1  ;;  %p181_p5 = scmp.lt.s32.totalorder %s665_s16, 3 }
  0x18   : > { %s498_s5 = sshra.s32 %s155_s29, 4  ;;  %p502_p8 = pneg %p765_p2  ;;  %s499_s5 = int_to_ptr.hbm [resolvable:$true] %s498_s5 }
  0x19   : > { %s500_s6 = scalar_lea.hbm %s499_s5, 2  ;;  %s505_s12 = scalar_lea.hbm %s868_s0, 2 }
  0x1a   : > { %p501_p7 = scmp.ne.s32.totalorder %s499_s5, %s500_s6  ;;  %p507_p4 = scmp.lt.s32.totalorder %s505_s12, %s500_s6 }
  0x1c   : > { %p503_p9 = pnand %p502_p8, %p501_p7 }
  0x1e   : > { %p504_p10 = pneg %p503_p9 }
  0x20   : > { %p509_p11 = pnand %p507_p4, %p504_p10 }
  0x22   : > { %512 = shalt.err (!%p509_p11)
}
  0x23   : > { %409 = dma.hbm_to_vmem [thread:$0]  (!%p765_p2), %s155_s29, 32, %s157_s3, [#allocation3]  }
  0x24   : > { %p785_p1 = pnand %p395_p3, %p181_p5  ;;  %s174_s22 = sshll.u32 %s869_s1, 4  ;;  %s175_s22 = int_to_ptr.hbm [resolvable:$true] %s174_s22 }
  0x25   : > { %s668_s23 = smov [#allocation5]   ;;  %s528_s28 = sshra.s32 %s175_s22, 4  ;;  %s529_s28 = int_to_ptr.hbm [resolvable:$true] %s528_s28 }
  0x26   : > { %s176_s27 = sshll.u32 %s668_s23, 4  ;;  %s530_s30 = scalar_lea.hbm %s529_s28, 1  ;;  %s177_s27 = int_to_ptr.vmem [resolvable:$true] %s176_s27 }
  0x27   : > { %p531_p7 = scmp.ne.s32.totalorder %s529_s28, %s530_s30  ;;  %s535_s5 = scalar_lea.hbm %s869_s1, 1 }
  0x28   : > { %p537_p3 = scmp.lt.s32.totalorder %s535_s5, %s530_s30 }
  0x29   : > { %p533_p9 = pnand %p531_p7, %p502_p8 }
  0x2b   : > { %p534_p10 = pneg %p533_p9 }
  0x2d   : > { %p539_p5 = pnand %p537_p3, %p534_p10 }
  0x2f   : > { %542 = shalt.err (!%p539_p5)
}
  0x30   : > { %412 = dma.hbm_to_vmem [thread:$0]  (!%p765_p2), %s175_s22, 16, %s177_s27, [#allocation6]  }
  0x31   : > { %185 = sbr.rel (%p785_p1) target bundleno = 112 (0x70), region = 28  ;;  %s187_s6 = sand.u32 (!%p785_p1), 1, %s653_s13  }
  0x32   : > { %s396_s7 = sshll.u32 (!%p785_p1), %s187_s6, 1  ;;  %s188_s8 = scalar_lea.sflag (!%p785_p1), [#allocation3], %s187_s6 }
  0x33   : > { %s191_s12 = scalar_lea.vmem (!%p785_p1), [#allocation2], %s396_s7 }
  0x36   : > { %623 = dma.done.wait (%p736_p6), %s188_s8, 32  }
  0x37   : > { %625 = vsyncadd (%p736_p6), %s188_s8, 4294967264  ;;  %s198_s18 = scalar_lea.sflag [#allocation6], %s187_s6  ;;  %s200_s20 = scalar_lea.vmem [#allocation5], %s187_s6 }
  0x38   : > { %627 = dma.done.wait (%p736_p6), %s198_s18, 16  }
  0x39   : > { %629 = vsyncadd (%p736_p6), %s198_s18, 4294967280  ;;  %s223_s4 = sand.u32 1, %s641_s10   ;;  %v669_v0 = vmov 0.0   ;;  %vm238_vm0 = vcmask 1041408   ;;  %v236_v1 = vld [vmem:[%s191_s12] sm:$0x3]  ;;  %v258_v4 = vlaneseq  ;;  %s292_s27 = scalar_lea.hbm %s870_s2, %s657_s14 }
  0x3a   : > { %s814_s17 = scalar_lea.vmem [#allocation7], %s223_s4  ;;  %v239_v2 = vsel %vm238_vm0, %v236_v1, -inf  ;;  %v493_v8 = vld [vmem:[%s200_s20] ss:$0 sm:$0xff]  ;;  %v670_v12 = vmov 0.05  }
  0x3b   : > { %235 = vst [vmem:[%s814_s17] sm:$0x1] %v669_v0  ;;  %v240_v3 = vrot.slane %v239_v2, 4  ;;  %v259_v7 = vshrl.u32 %v258_v4, 7  ;;  %s397_s21 = sshll.u32 %s657_s14, 7  ;;  %v275_v30 = vand.u32 127, %v258_v4  ;;  %s294_s28 = sshll.u32 %s814_s17, 4  ;;  %s295_s28 = int_to_ptr.vmem [resolvable:$true] %s294_s28 }
  0x3c   : > { %v276_v32 = vstv %s397_s21  ;;  %s296_s30 = sshll.u32 %s292_s27, 4  ;;  %s284_s29 = scalar_lea.sflag [#allocation4], %s223_s4  ;;  %s297_s30 = int_to_ptr.hbm [resolvable:$true] %s296_s30 }
  0x3d   : > { %v241_v5 = vmax.f32 %v239_v2, %v240_v3  ;;  %vm261_vm1 = vcmp.eq.s32.totalorder %v259_v7, %v493_v8  ;;  %v277_v33 = vadd.s32 %v276_v32, %v275_v30  ;;  %s572_s3 = sshra.s32 %s297_s30, 4  ;;  %s578_s7 = scalar_lea.hbm %s870_s2, 2  ;;  %s573_s3 = int_to_ptr.hbm [resolvable:$true] %s572_s3 }
  0x3e   : > { %v262_v13 = vsel %vm261_vm1, 0.95, %v670_v12  ;;  %s574_s5 = scalar_lea.hbm %s573_s3, 1  ;;  %p579_p4 = scmp.lt.s32.totalorder %s573_s3, %s870_s2 }
  0x3f   : > { %v242_v6 = vrot.slane %v241_v5, 2  ;;  %vm278_vm2 = vcmp.lt.s32.totalorder %v277_v33, 16  ;;  %p575_p6 = scmp.ne.s32.totalorder %s573_s3, %s574_s5  ;;  %p580_p11 = scmp.lt.s32.totalorder %s578_s7, %s574_s5 }
  0x41   : > { %v243_v9 = vmax.f32 %v241_v5, %v242_v6  ;;  %p576_p2 = pnand %p575_p6, %p750_p12  ;;  %p581_p1 = por %p580_p11, %p579_p4 }
  0x42   : > { %v280_v38 = vld [vmem:[%s814_s17] sm:$0x1] }
  0x43   : > { %v244_v10 = vrot.slane %v243_v9, 1  ;;  %p577_p8 = pneg %p576_p2 }
  0x45   : > { %v245_v11 = vmax.f32 %v243_v9, %v244_v10  ;;  %p582_p7 = pnand %p581_p1, %p577_p8 }
  0x47   : > { %v246_v14 = vsub.f32 %v236_v1, %v245_v11 }
  0x49   : > { %v247_v15 = vmul.f32 1.442695, %v246_v14  ;;  %v263_v16 = vmul.f32 %v262_v13, %v246_v14 }
  0x4b   : > { %494 = vpow2.f32 %v247_v15  ;;  %v264_v17 = vsel %vm238_vm0, %v263_v16, 0.0 }
  0x4c   : > { %v265_v18 = vrot.slane %v264_v17, 4 }
  0x4e   : > { %v266_v22 = vadd.f32 %v265_v18, %v264_v17 }
  0x50   : > { %v267_v25 = vrot.slane %v266_v22, 2 }
  0x51   : > { %v495_v19 = vpop.eup %494 }
  0x52   : > { %v249_v20 = vsel %vm238_vm0, %v495_v19, 0.0  ;;  %v268_v28 = vadd.f32 %v267_v25, %v266_v22 }
  0x53   : > { %v250_v21 = vrot.slane %v249_v20, 4 }
  0x54   : > { %v269_v31 = vrot.slane %v268_v28, 1 }
  0x55   : > { %v251_v23 = vadd.f32 %v250_v21, %v249_v20 }
  0x56   : > { %v270_v34 = vadd.f32 %v269_v31, %v268_v28 }
  0x57   : > { %v252_v24 = vrot.slane %v251_v23, 2 }
  0x59   : > { %v253_v26 = vadd.f32 %v252_v24, %v251_v23 }
  0x5b   : > { %v254_v27 = vrot.slane %v253_v26, 1 }
  0x5d   : > { %v255_v29 = vadd.f32 %v254_v27, %v253_v26 }
  0x5f   : > { %496 = vlog2.f32 %v255_v29 }
  0x65   : > { %v497_v35 = vpop.eup %496 }
  0x66   : > { %v257_v36 = vmul.f32 0.6931472, %v497_v35 }
  0x68   : > { %v271_v37 = vsub.f32 %v257_v36, %v270_v34 }
  0x6a   : > { %v279_v39 = vsel %vm278_vm2, %v271_v37, 0.0 }
  0x6b   : > { %v281_v40 = vadd.f32 %v280_v38, %v279_v39 }
  0x6d   : > { %282 = vst [vmem:[%s814_s17] sm:$0x1] %v281_v40 }
  0x6e   : > { %585 = shalt.err (!%p582_p7)
}
  0x6f   : > { %404 = dma.vmem_to_hbm [thread:$0]  (%p750_p12), %s295_s28, 16, %s297_s30, %s284_s29  }
  0x70 PF: > { %s308_s18 = sand.u32 1, %s637_s9   ;;  %p414_p9 = pnand %p392_p13, %p755_p0 }
  0x71   : > { %s309_s20 = scalar_lea.sflag [#allocation4], %s308_s18 }
  0x72   : > { %p415_p10 = pneg %p414_p9 }
  0x74   : > { %631 = dma.done.wait (%p415_p10), %s309_s20, 16  }
  0x75   : > { %633 = vsyncadd (%p415_p10), %s309_s20, 4294967280  ;;  %s21_s16 = sadd.s32 1, %s665_s16   ;;  %s877_s9 = smov %s641_s10 }
  0x76   : > { %p18_p3 = scmp.ge.s32.totalorder %s21_s16, 4   ;;  %s878_s10 = smov %s645_s11 }
  0x77   : > { %s879_s11 = smov %s744_s24  ;;  %s880_s12 = smov %s653_s13 }
  0x78   : > { %s858_s13 = smov 0   ;;  %s881_s14 = smov %s661_s15 }
  0x79   : > { %s882_s15 = smov %s884_s19  ;;  %20 = sbr.rel (!%p18_p3) target bundleno = 9 (0x9), region = 90 }
  0x7e   :  { %314 = vsyncpa [#allocation3], 1 }
  0x7f   :  { %316 = vsyncpa [#allocation3 + $0x1], 1 }
  0x80   :  { %317 = vsyncpa [#allocation6], 1 }
  0x81   :  { %319 = vsyncpa [#allocation6 + $0x1], 1 }
  0x82   :  { %320 = vsyncpa [#allocation4], 1 }
  0x83   :  { %322 = vsyncpa [#allocation4 + $0x1], 1 }

</bundles_post_ra>
